<compile_context>
chip_gen: v6e
topology: v6e:2x2x1
jax: 0.10.0
libtpu: 0.0.40
codegen_flags: <defaults>
</compile_context>

<pallas_src>
import functools

import jax
import jax.numpy as jnp
import numpy as np
from jax import lax
from jax.experimental import pallas as pl
from jax.experimental.pallas import tpu as pltpu

LANES = 128      # vreg lane width / feature slab width
SUBLANES = 8     # f32 sublane height
PACK = 16        # bf16 sublane packing granularity (row alignment)
BIAS_ROWS = 16   # rows 0/1 hold b1/b2 (lane-padded)
OUT_ROWS = 16    # sublane-padded output rows (n_output <= 16)


def _round_up(x, m):
    return (x + m - 1) // m * m


# ----------------------------------------------------------------------------
# Kernel: 3-layer MLP, fully VMEM-resident, bf16 MXU dots with f32 accumulation.
# Final layer computed transposed so the output block is a tiny lane-dense
# (OUT_ROWS, TB) slab.
# ----------------------------------------------------------------------------
def _make_critic_kernel(Kp):
    F = LANES
    off_w1 = BIAS_ROWS
    off_w2 = off_w1 + Kp
    off_w3 = off_w2 + F
    off_b3 = off_w3 + OUT_ROWS

    def kernel(x_ref, p_ref, q_ref):
        # Aligned 16-row bias block, value-sliced into rows (f32 for the adds).
        bias_blk = p_ref[0:BIAS_ROWS, :].astype(jnp.float32)        # (16, 128)
        b1 = bias_blk[0:1, :]                                        # (1, 128)
        b2 = bias_blk[1:2, :]                                        # (1, 128)
        # b3 stored as a lane-0 column -> (OUT_ROWS, 1), lane-broadcast on add.
        b3_col = p_ref[off_b3:off_b3 + OUT_ROWS, :].astype(jnp.float32)[:, 0:1]

        w1 = p_ref[off_w1:off_w1 + Kp, :]          # (Kp, 128)  bf16
        w2 = p_ref[off_w2:off_w2 + F, :]           # (128, 128) bf16
        w3t = p_ref[off_w3:off_w3 + OUT_ROWS, :]   # (16, 128)  bf16 (W3^T)

        x = x_ref[...]                                              # (TB, Kp) bf16
        h1 = jnp.dot(x, w1, preferred_element_type=jnp.float32)     # (TB, 128) f32
        h1 = jnp.maximum(h1 + b1, 0.0).astype(jnp.bfloat16)

        h2 = jnp.dot(h1, w2, preferred_element_type=jnp.float32)
        h2 = jnp.maximum(h2 + b2, 0.0).astype(jnp.bfloat16)

        # Transposed final layer: contract feature dims of W3^T (16,128) and
        # h2 (TB,128) -> (OUT_ROWS, TB).  Same dim-numbers as flash-attn A@B^T.
        q_t = lax.dot_general(w3t, h2, (((1,), (1,)), ((), ())),
                              preferred_element_type=jnp.float32)
        q_ref[...] = (q_t + b3_col).astype(q_ref.dtype)             # (16, TB) lane-dense

    return kernel


# ----------------------------------------------------------------------------
# Parameter packing: one zero-padded bf16 (BIAS_ROWS + Kp + 128 + 2*16, 128)
# buffer.  Done once at setup time (like moving module params to device).
#   rows [0:16)            : row 0 = b1, row 1 = b2 (lanes [0:n_features))
#   rows [16      : 16+Kp) : W1  (n_input,    n_features), zero-padded
#   rows [..      : ..+128): W2  (n_features, n_features), zero-padded
#   rows [..      : ..+16) : W3^T (n_output,  n_features), zero-padded
#   rows [..      : ..+16) : b3 stored as a column in lane 0
# ----------------------------------------------------------------------------
def pack_params(params, n_state, n_action, n_features, n_output):
    w1, b1, w2, b2, w3, b3 = params              # weights are (in, out)
    n_input = n_state + n_action
    F = LANES
    assert n_features <= F and n_output <= OUT_ROWS
    Kp = _round_up(n_input, PACK)
    total_rows = BIAS_ROWS + Kp + F + 2 * OUT_ROWS

    buf = jnp.zeros((total_rows, F), jnp.float32)
    buf = buf.at[0, :n_features].set(jnp.reshape(b1, (-1,)))
    buf = buf.at[1, :n_features].set(jnp.reshape(b2, (-1,)))

    off = BIAS_ROWS
    buf = buf.at[off:off + n_input, :n_features].set(w1)
    off += Kp
    buf = buf.at[off:off + n_features, :n_features].set(w2)
    off += F
    buf = buf.at[off:off + n_output, :n_features].set(jnp.transpose(w3))  # W3^T
    off += OUT_ROWS
    buf = buf.at[off:off + n_output, 0].set(jnp.reshape(b3, (-1,)))
    return buf.astype(jnp.bfloat16)


# ----------------------------------------------------------------------------
# Pallas-backed equivalent of CriticNetwork.forward(state, action).
# ----------------------------------------------------------------------------
@functools.partial(jax.jit, static_argnames=("n_output",))
def critic_forward(state, action, packed_params, n_output=1):
    B, n_state = state.shape
    _, n_action = action.shape
    n_input = n_state + n_action
    F = LANES
    Kp = _round_up(n_input, PACK)
    assert packed_params.shape == (BIAS_ROWS + Kp + F + 2 * OUT_ROWS, F)
    assert packed_params.dtype == jnp.bfloat16

    # Batch tiling:
    #  * tiny batches -> one tile (grid collapses to (1,));
    #  * larger batches -> >= 2 tiles so the "parallel" batch axis shards across
    #    both TensorCores on v7x; tile capped at 512 rows and kept a multiple of
    #    128 so the (OUT_ROWS, TB) output block stays lane-dense.
    Bp16 = _round_up(B, PACK)
    if Bp16 <= 256:
        TB = Bp16
    else:
        TB = min(_round_up(pl.cdiv(Bp16, 2), LANES), 512)
    Bp = _round_up(B, TB)
    grid = (Bp // TB,)

    # One fused concat + pad + bf16 cast -> single contiguous (Bp, Kp) slab.
    x = jnp.concatenate([state.astype(jnp.float32), action.astype(jnp.float32)],
                        axis=1)
    x = jnp.pad(x, ((0, Bp - B), (0, Kp - n_input))).astype(jnp.bfloat16)

    kernel = _make_critic_kernel(Kp)

    flops = 2 * Bp * (Kp * F + F * F + F * OUT_ROWS)
    bytes_accessed = x.size * 2 + packed_params.size * 2 + OUT_ROWS * Bp * 4

    q_t = pl.pallas_call(
        kernel,
        out_shape=jax.ShapeDtypeStruct((OUT_ROWS, Bp), jnp.float32),
        grid=grid,
        in_specs=[
            pl.BlockSpec((TB, Kp), lambda i: (i, 0)),                 # batch tile of x
            pl.BlockSpec(packed_params.shape, lambda i: (0, 0)),      # all params, 1 DMA
        ],
        out_specs=pl.BlockSpec((OUT_ROWS, TB), lambda i: (0, i)),     # lane-dense (16,TB)
        compiler_params=pltpu.CompilerParams(
            dimension_semantics=("parallel",)),
        cost_estimate=pl.CostEstimate(
            flops=int(flops), transcendentals=0,
            bytes_accessed=int(bytes_accessed)),
    )(x, packed_params)

    q = jnp.transpose(q_t[:n_output, :B])        # (B, n_output)
    return jnp.squeeze(q)                        # matches torch.squeeze(q)


# ----------------------------------------------------------------------------
# Deterministic parameter init (mirrors the module's __init__):
#   xavier_uniform with relu gain for h1/h2, linear gain for h3;
#   PyTorch-default uniform(-1/sqrt(fan_in), 1/sqrt(fan_in)) biases.
# Weights are stored transposed to (in_features, out_features).
# ----------------------------------------------------------------------------
def xavier_uniform(key, fan_in, fan_out, gain):
    bound = gain * np.sqrt(6.0 / (fan_in + fan_out))
    return jax.random.uniform(key, (fan_in, fan_out), jnp.float32,
                              minval=-bound, maxval=bound)


def init_params(key, n_input, n_features, n_output):
    ks = jax.random.split(key, 6)
    relu_gain = np.sqrt(2.0)
    lin_gain = 1.0
    w1 = xavier_uniform(ks[0], n_input, n_features, relu_gain)
    w2 = xavier_uniform(ks[1], n_features, n_features, relu_gain)
    w3 = xavier_uniform(ks[2], n_features, n_output, lin_gain)
    b1 = jax.random.uniform(ks[3], (1, n_features), jnp.float32,
                            minval=-1.0 / np.sqrt(n_input),
                            maxval=1.0 / np.sqrt(n_input))
    b2 = jax.random.uniform(ks[4], (1, n_features), jnp.float32,
                            minval=-1.0 / np.sqrt(n_features),
                            maxval=1.0 / np.sqrt(n_features))
    b3 = jax.random.uniform(ks[5], (1, n_output), jnp.float32,
                            minval=-1.0 / np.sqrt(n_features),
                            maxval=1.0 / np.sqrt(n_features))
    return (w1, b1, w2, b2, w3, b3)


def reference_q(params, state, action):
    """Plain-JAX f32 reference mirroring the PyTorch forward."""
    w1, b1, w2, b2, w3, b3 = params
    x = jnp.concatenate([state, action], axis=1)
    h1 = jnp.maximum(x @ w1 + b1, 0.0)
    h2 = jnp.maximum(h1 @ w2 + b2, 0.0)
    return jnp.squeeze(h2 @ w3 + b3)


# ----------------------------------------------------------------------------
if __name__ == "__main__":
    # Small shapes consistent with the module: n_input = n_state + n_action,
    # scalar Q output, n_features = 32.
    batch = 8
    n_state = 6
    n_action = 2
    n_input = n_state + n_action
    n_features = 32
    n_output = 1

    key = jax.random.PRNGKey(0)
    k_params, k_state, k_action, k_state2, k_action2 = jax.random.split(key, 5)

    params = init_params(k_params, n_input, n_features, n_output)
    packed = pack_params(params, n_state, n_action, n_features, n_output)

    # --- tiny batch (single tile, grid=(1,)) ---------------------------------
    state = jax.random.normal(k_state, (batch, n_state), jnp.float32)
    action = jax.random.normal(k_action, (batch, n_action), jnp.float32)

    q = critic_forward(state, action, packed, n_output=n_output)
    q = jax.block_until_ready(q)

    q_ref = reference_q(params, state, action)
    # bf16 params/activations (f32 accumulation) -> loosened tolerance vs f32 ref.
    np.testing.assert_allclose(np.asarray(q), np.asarray(q_ref),
                               rtol=5e-2, atol=5e-2)
    assert q.shape == (batch,)

    # --- larger batch (exercises the multi-tile / dual-TensorCore grid path) --
    big_batch = 640
    state2 = jax.random.normal(k_state2, (big_batch, n_state), jnp.float32)
    action2 = jax.random.normal(k_action2, (big_batch, n_action), jnp.float32)

    q_big = critic_forward(state2, action2, packed, n_output=n_output)
    q_big = jax.block_until_ready(q_big)

    q_big_ref = reference_q(params, state2, action2)
    np.testing.assert_allclose(np.asarray(q_big), np.asarray(q_big_ref),
                               rtol=5e-2, atol=5e-2)
    assert q_big.shape == (big_batch,)

    print("KERNEL_OK")
</pallas_src>

<mosaic_0001>
module attributes {stable_mosaic.version = 11 : i64} {
  func.func @kernel(%arg0: i32, %arg1: memref<16x16xbf16, #tpu.memory_space<vmem>>, %arg2: memref<192x128xbf16, #tpu.memory_space<vmem>>, %arg3: memref<16x16xf32, #tpu.memory_space<vmem>>) attributes {dimension_semantics = [#tpu.dimension_semantics<parallel>], iteration_bounds = array<i64: 1>, scalar_prefetch = 0 : i64, scratch_operands = 0 : i64, tpu.core_type = #tpu.core_type<tc>, window_params = [{transform_indices = @transform_0, window_bounds = array<i64: 16, 16>}, {pipeline_mode = #tpu.pipeline_mode<synchronous>, transform_indices = @transform_1, window_bounds = array<i64: 192, 128>}, {transform_indices = @transform_2, window_bounds = array<i64: 16, 16>}]} {
    %c0 = arith.constant 0 : index
    %c0_0 = arith.constant 0 : index
    %0 = vector.load %arg2[%c0, %c0_0] : memref<192x128xbf16, #tpu.memory_space<vmem>>, vector<16x128xbf16>
    %1 = arith.extf %0 : vector<16x128xbf16> to vector<16x128xf32>
    %2 = vector.extract_strided_slice %1 {offsets = [0, 0], sizes = [1, 128], strides = [1, 1]} : vector<16x128xf32> to vector<1x128xf32>
    %3 = vector.extract_strided_slice %1 {offsets = [1, 0], sizes = [1, 128], strides = [1, 1]} : vector<16x128xf32> to vector<1x128xf32>
    %c176 = arith.constant 176 : index
    %c0_1 = arith.constant 0 : index
    %4 = vector.load %arg2[%c176, %c0_1] : memref<192x128xbf16, #tpu.memory_space<vmem>>, vector<16x128xbf16>
    %5 = arith.extf %4 : vector<16x128xbf16> to vector<16x128xf32>
    %6 = vector.extract_strided_slice %5 {offsets = [0, 0], sizes = [16, 1], strides = [1, 1]} : vector<16x128xf32> to vector<16x1xf32>
    %c16 = arith.constant 16 : index
    %c0_2 = arith.constant 0 : index
    %7 = vector.load %arg2[%c16, %c0_2] : memref<192x128xbf16, #tpu.memory_space<vmem>>, vector<16x128xbf16>
    %c32 = arith.constant 32 : index
    %c0_3 = arith.constant 0 : index
    %8 = vector.load %arg2[%c32, %c0_3] : memref<192x128xbf16, #tpu.memory_space<vmem>>, vector<128x128xbf16>
    %c160 = arith.constant 160 : index
    %c0_4 = arith.constant 0 : index
    %9 = vector.load %arg2[%c160, %c0_4] : memref<192x128xbf16, #tpu.memory_space<vmem>>, vector<16x128xbf16>
    %c0_5 = arith.constant 0 : index
    %c0_6 = arith.constant 0 : index
    %10 = vector.load %arg1[%c0_5, %c0_6] : memref<16x16xbf16, #tpu.memory_space<vmem>>, vector<16x16xbf16>
    %cst = arith.constant dense<0.000000e+00> : vector<16x128xf32>
    %11 = tpu.matmul %10, %7, %cst {dimension_numbers = #tpu.dot_dimension_numbers<[1], [0], [0], [1], [0, 0, 1, 1], [], []>} : vector<16x16xbf16>, vector<16x128xbf16>, vector<16x128xf32> -> vector<16x128xf32>
    %12 = vector.broadcast %2 : vector<1x128xf32> to vector<16x128xf32>
    %13 = arith.addf %11, %12 : vector<16x128xf32>
    %cst_7 = arith.constant 0.000000e+00 : f32
    %14 = vector.broadcast %cst_7 : f32 to vector<16x128xf32>
    %15 = arith.maximumf %13, %14 : vector<16x128xf32>
    %16 = arith.truncf %15 : vector<16x128xf32> to vector<16x128xbf16>
    %cst_8 = arith.constant dense<0.000000e+00> : vector<16x128xf32>
    %17 = tpu.matmul %16, %8, %cst_8 {dimension_numbers = #tpu.dot_dimension_numbers<[1], [0], [0], [1], [0, 0, 1, 1], [], []>} : vector<16x128xbf16>, vector<128x128xbf16>, vector<16x128xf32> -> vector<16x128xf32>
    %18 = vector.broadcast %3 : vector<1x128xf32> to vector<16x128xf32>
    %19 = arith.addf %17, %18 : vector<16x128xf32>
    %cst_9 = arith.constant 0.000000e+00 : f32
    %20 = vector.broadcast %cst_9 : f32 to vector<16x128xf32>
    %21 = arith.maximumf %19, %20 : vector<16x128xf32>
    %22 = arith.truncf %21 : vector<16x128xf32> to vector<16x128xbf16>
    %cst_10 = arith.constant dense<0.000000e+00> : vector<16x16xf32>
    %23 = tpu.matmul %9, %22, %cst_10 {dimension_numbers = #tpu.dot_dimension_numbers<[1], [1], [0], [0], [0, 0, 1, 0], [], []>} : vector<16x128xbf16>, vector<16x128xbf16>, vector<16x16xf32> -> vector<16x16xf32>
    %24 = vector.broadcast %6 : vector<16x1xf32> to vector<16x16xf32>
    %25 = arith.addf %23, %24 : vector<16x16xf32>
    %c0_11 = arith.constant 0 : index
    %c0_12 = arith.constant 0 : index
    %26 = vector.load %arg3[%c0_11, %c0_12] : memref<16x16xf32, #tpu.memory_space<vmem>>, vector<16x16xf32>
    tpu.vector_store %arg3[%c0_11, %c0_12], %25 {strides = array<i32>} : memref<16x16xf32, #tpu.memory_space<vmem>>, vector<16x16xf32>,
    return
  }
  func.func @transform_0(%arg0: i32) -> (i32, i32) {
    %c0_i32 = arith.constant 0 : i32
    %c0_i32_0 = arith.constant 0 : i32
    return %arg0, %c0_i32 : i32, i32
  }
  func.func @transform_1(%arg0: i32) -> (i32, i32) {
    %c0_i32 = arith.constant 0 : i32
    %c0_i32_0 = arith.constant 0 : i32
    %c0_i32_1 = arith.constant 0 : i32
    return %c0_i32, %c0_i32_0 : i32, i32
  }
  func.func @transform_2(%arg0: i32) -> (i32, i32) {
    %c0_i32 = arith.constant 0 : i32
    %c0_i32_0 = arith.constant 0 : i32
    return %c0_i32, %arg0 : i32, i32
  }
}

</mosaic_0001>

<bundles_post_ra>
// kernel: critic_forward.1
= control target key start
LH: loop header
LB: loop body
LE: loop exit
PB: predicated region body
PF: predicated region fallthrough
CT: control target
= control target key end

     0   :  { %7 = vsyncpa [#allocation3], 0  ;;  %s386_s9 = smov [#allocation2]   ;;  %s422_s0 = inlined_call_operand.vmem [shape: bf16[16,16], index: 0, kind: input, shape index: {}]   ;;  %s423_s1 = inlined_call_operand.hbm [shape: bf16[192,128], index: 1, kind: input, shape index: {}]   ;;  %s424_s2 = inlined_call_operand.vmem [shape: f32[16,16], index: 2, kind: output, shape index: {}]  }
   0x1   :  { %s15_s10 = sshll.u32 %s386_s9, 4  ;;  %s16_s10 = int_to_ptr.vmem [resolvable:$true] %s15_s10 }
   0x2   :  { %s372_s11 = scalar_lea.vmem %s16_s10, 1536  ;;  %p377_p1 = scmp.lt.s32.totalorder %s16_s10, %s16_s10 }
   0x3   :  { %p373_p0 = scmp.ne.s32.totalorder %s16_s10, %s372_s11  ;;  %p378_p2 = scmp.lt.s32.totalorder %s372_s11, %s372_s11 }
   0x5   :  { %p379_p3 = por %p378_p2, %p377_p1 }
   0x7   :  { %p380_p4 = pnand %p379_p3, %p373_p0 }
   0x9   :  { %383 = shalt.err (!%p380_p4)
}
   0xa   :  { %s387_s12 = smov 64   ;;  %s388_s13 = smov 4  }
   0xb   :  { %21 = dma.hbm_to_vmem [thread:$0]  %s423_s1, 1536, %s16_s10, [#allocation3], %s387_s12, %s387_s12, %s388_s13  }
   0xc   :  { %384 = dma.done.wait [#allocation3], 1536  }
   0xd   :  { %385 = vsyncadd [#allocation3], 4294965760  ;;  %v389_v0 = vmov 0.0   ;;  %vm390_vm0 = vmmov 0   ;;  %v351_v1 = vld [vmem:[#allocation2 + $0x8] sm:$0xff]   ;;  %v352_v2 = vld [vmem:[%s422_s0] sm:$0xff]   ;;  %v54_v11 = vlaneseq }
   0xe   :  { %307 = vmatprep.subr.bf16.mxu0 %v389_v0  ;;  %309 = vmatprep.mubr.msk.bf16.mxu0 %vm390_vm0, %v389_v0  ;;  %vm69_vm1 = vcmask 130048   ;;  %v353_v3 = vld [vmem:[#allocation2 + $0x48] sm:$0xff]   ;;  %v354_v4 = vld [vmem:[#allocation2 + $0x40] sm:$0xff]   ;;  %v355_v5 = vld [vmem:[#allocation2 + $0x38] sm:$0xff]   ;;  %v391_v27 = vmov 0  }
   0xf   :  { %313 = vmatprep.subr.bf16.mxu1 %v389_v0  ;;  %329 = vmatprep.mubr.msk.bf16.mxu1 %vm390_vm0, %v389_v0  ;;  %v356_v6 = vld [vmem:[#allocation2 + $0x30] sm:$0xff]   ;;  %v357_v7 = vld [vmem:[#allocation2 + $0x28] sm:$0xff]   ;;  %v358_v8 = vld [vmem:[#allocation2 + $0x20] sm:$0xff]   ;;  %v55_v12 = vshrl.u32 %v54_v11, 7 }
  0x10   :  { %308 = vmatpush3.bf16.msra.mxu0 %v351_v1  ;;  %314 = vmatpush3.bf16.msra.mxu1 %v353_v3  ;;  %v359_v9 = vld [vmem:[#allocation2 + $0x18] sm:$0xff]   ;;  %v360_v10 = vld [vmem:[#allocation2 + $0x10] sm:$0xff]   ;;  %v26_v13 = vld [vmem:[#allocation2] sm:$0xf] }
  0x11   :  { %333 = vmatprep.subr.bf16.mxu0 %v389_v0  ;;  %315 = vmatprep.subr.bf16.mxu1 %v389_v0  ;;  %v27_v14 = vunpack.c.l.bf16 %v26_v13  ;;  %v56_v15 = vsub.s32 0, %v55_v12  ;;  %v293_v26 = vld [vmem:[#allocation2 + $0x58] sm:$0xff]   ;;  %v119_v31 = vsub.s32 1, %v55_v12  ;;  %v361_v42 = vld [vmem:[#allocation2 + $0x50] sm:$0xff]  }
  0x12   :  { %345 = vset.pattern.permute.xlu0 %v391_v27  ;;  %v291_v28 = vunpack.c.l.bf16 %v293_v26  ;;  %v292_v29 = vunpack.c.h.bf16 %v293_v26 }
  0x13   :  { %310 = vmatmul.mubr.msk.bf16.vlgmr.msra.gmra.mxu0 %vm69_vm1, %v352_v2  ;;  %v57_v16 = vrot.slane %v27_v14, %v56_v15  ;;  %v120_v32 = vrot.slane %v27_v14, %v119_v31 }
  0x14   :  { %335 = vmatprep.mubr.msk.bf16.mxu0 %vm390_vm0, %v389_v0  ;;  %316 = vmatpush3.bf16.msra.mxu1 %v354_v4  ;;  %v346_v30 = vpack.i.bf16 %v292_v29, %v291_v28 }
  0x15   :  { %317 = vmatprep.subr.bf16.mxu1 %v389_v0 }
  0x16   :  { %347 = vperm.xlu0 %345, %v346_v30  }
  0x18   :  { %318 = vmatpush3.bf16.msra.mxu1 %v355_v5 }
  0x19   :  { %319 = vmatprep.subr.bf16.mxu1 %v389_v0 }
  0x1c   :  { %320 = vmatpush3.bf16.msra.mxu1 %v356_v6 }
  0x1d   :  { %321 = vmatprep.subr.bf16.mxu1 %v389_v0 }
  0x20   :  { %322 = vmatpush3.bf16.msra.mxu1 %v357_v7 }
  0x21   :  { %323 = vmatprep.subr.bf16.mxu1 %v389_v0 }
  0x24   :  { %324 = vmatpush3.bf16.msra.mxu1 %v358_v8 }
  0x25   :  { %325 = vmatprep.subr.bf16.mxu1 %v389_v0 }
  0x28   :  { %326 = vmatpush3.bf16.msra.mxu1 %v359_v9 }
  0x29   :  { %327 = vmatprep.subr.bf16.mxu1 %v389_v0 }
  0x2c   :  { %328 = vmatpush3.bf16.msra.mxu1 %v360_v10 }
  0x91   :  { %v348_v43 = vpop.permute.xlu0 %347 }
  0xd3   :  { %v107_v17 = vpop.f32.mrf.mxu0 }
  0xd4   :  { %v108_v19 = vadd.f32 %v107_v17, %v57_v16 }
  0xd5   :  { %v311_v18 = vpop.f32.mrf.mxu0 }
  0xd6   :  { %v114_v23 = vmax.f32 %v108_v19, 0.0 }
  0xd7   :  { %v110_v20 = vpop.f32.mrf.mxu0 }
  0xd8   :  { %v111_v21 = vadd.f32 %v110_v20, %v57_v16 }
  0xd9   :  { %v312_v22 = vpop.f32.mrf.mxu0 }
  0xda   :  { %v115_v24 = vmax.f32 %v111_v21, 0.0 }
  0xdc   :  { %v116_v25 = vpack.c.bf16 %v115_v24, %v114_v23 }
  0xde   :  { %330 = vmatmul.mubr.bf16.vlgmr.msra.gmra.mxu1 %v116_v25 }
 0x19e   :  { %v203_v33 = vpop.f32.mrf.mxu1 }
 0x19f   :  { %v204_v35 = vadd.f32 %v203_v33, %v120_v32 }
 0x1a0   :  { %v331_v34 = vpop.f32.mrf.mxu1 }
 0x1a1   :  { %v210_v39 = vmax.f32 %v204_v35, 0.0 }
 0x1a2   :  { %v206_v36 = vpop.f32.mrf.mxu1 }
 0x1a3   :  { %v207_v37 = vadd.f32 %v206_v36, %v120_v32 }
 0x1a4   :  { %v332_v38 = vpop.f32.mrf.mxu1 }
 0x1a5   :  { %v211_v40 = vmax.f32 %v207_v37, 0.0 }
 0x1a7   :  { %v212_v41 = vpack.c.bf16 %v211_v40, %v210_v39 }
 0x1a9   :  { %334 = vmatpush3.bf16.xpose.msra.mxu0 %v212_v41 }
 0x1b0   :  { %336 = vmatmul.mubr.bf16.vlgmr.msra.gmra.mxu0 %v361_v42 }
 0x270   :  { %v263_v44 = vpop.f32.mrf.mxu0 }
 0x271   :  { %v362_v45 = vadd.low.f32.bf16 %v263_v44, %v348_v43 }
 0x272   :  { %v337_v46 = vpop.f32.mrf.mxu0 }
 0x273   :  { %270 = vst.msk [vmem:[%s424_s2] sm:$0xff] %vm69_vm1, %v362_v45 }
 0x274   :  { %v266_v47 = vpop.f32.mrf.mxu0 }
 0x275   :  { %v363_v48 = vadd.high.f32.bf16 %v266_v47, %v348_v43 }
 0x276   :  { %v338_v49 = vpop.f32.mrf.mxu0 }
 0x277   :  { %271 = vst.msk [vmem:[%s424_s2 + $0x8] sm:$0xff] %vm69_vm1, %v363_v48 }
 0x278   :  { %276 = vsyncpa [#allocation3], 1 }

</bundles_post_ra>
